<compile_context>
chip_gen: v6e
topology: v6e:2x2x1
jax: 0.10.0
libtpu: 0.0.40
codegen_flags: <defaults>
</compile_context>

<pallas_src>
import functools

import jax
import jax.numpy as jnp
from jax.experimental import pallas as pl
from jax.experimental.pallas import tpu as pltpu


_MXU_MIN_CIN = 32  # below this, the 1x1 conv runs on the VPU instead of the MXU


def _dsconv1d_kernel(x_ref, wdw_ref, wpw_ref, bpw_ref, o_ref, *,
                     k, b_tile, cin, cout, seq_len, use_bf16_matmul):
    """One grid step processes `b_tile` batch elements in NCL layout.

    x_ref  : (b_tile, Cin, L)   input block
    wdw_ref: (Cin, k)           depthwise weights (channel, tap), f32
    wpw_ref: (Cout, Cin)        pointwise weights, f32
    bpw_ref: (Cout, 1)          fused bias  (Wpw @ bdw + bpw), f32
    o_ref  : (b_tile, Cout, L)  output block
    """
    f32 = jnp.float32
    pad = k // 2

    wdw = wdw_ref[...]                        # (Cin, k)
    wpw = wpw_ref[...]                        # (Cout, Cin)
    bpw = bpw_ref[...]                        # (Cout, 1)

    x = x_ref[...]                            # (b_tile, Cin, L)
    if x.dtype != f32:
        x = x.astype(f32)

    # Depthwise conv: "same" zero padding along L once for the whole batch
    # tile, then k static lane-shifted slices accumulated on the VPU.
    if pad > 0:
        zpad = jnp.zeros((b_tile, cin, pad), dtype=f32)
        xp = jnp.concatenate([zpad, x, zpad], axis=2)    # (b_tile, Cin, L+2p)
    else:
        xp = x
    acc = xp[:, :, 0:seq_len] * wdw[:, 0:1][None]
    for t in range(1, k):
        acc = acc + xp[:, :, t:t + seq_len] * wdw[:, t:t + 1][None]

    # Pointwise 1x1 conv.
    if cin >= _MXU_MIN_CIN:
        # Enough channels to feed the MXU: per-batch (Cout,Cin)x(Cin,L) matmul
        # keeps the (sublane=C, lane=L) layout with no transposes.
        cast = (lambda a: a.astype(jnp.bfloat16)) if use_bf16_matmul else (lambda a: a)
        y = jnp.stack(
            [jnp.dot(cast(wpw), cast(acc[b]), preferred_element_type=f32)
             for b in range(b_tile)], axis=0)            # (b_tile, Cout, L)
    else:
        # Tiny channel count: an MXU matmul would use <4% of the array; a VPU
        # broadcast-accumulate over Cin is strictly faster here.
        y = wpw[None, :, 0:1] * acc[:, 0:1, :]
        for c in range(1, cin):
            y = y + wpw[None, :, c:c + 1] * acc[:, c:c + 1, :]

    o_ref[...] = (y + bpw[None]).astype(o_ref.dtype)


def _pick_b_tile(n, cin, cout, seq_len, itemsize,
                 budget_bytes=8 << 20, max_b_tile=8):
    """Largest divisor of n (capped) whose double-buffered block fits budget."""
    # ~2x for input/output double-buffering, ~2x slack for in-body temporaries.
    per_elem = 4 * (cin + cout) * seq_len * itemsize
    best = 1
    for cand in range(1, min(n, max_b_tile) + 1):
        if n % cand == 0 and cand * per_elem <= budget_bytes:
            best = cand
    return best


def depthwise_separable_conv1d(x_ncl, w_dw, b_dw, w_pw, b_pw, *, k,
                               use_bf16_matmul=False):
    """x_ncl: (N, Cin, L); weights in PyTorch Conv1d layouts.

    w_dw: (Cin, 1, k),  b_dw: (Cin,)
    w_pw: (Cout, Cin, 1), b_pw: (Cout,)
    Returns (N, Cout, L).
    """
    n, cin, seq_len = x_ncl.shape
    cout = w_pw.shape[0]
    if k % 2 != 1:
        raise NotImplementedError(
            "Even kernel sizes change the output length in PyTorch "
            "(padding=k//2); only odd k is supported here.")
    assert k // 2 < seq_len, "kernel half-width must be smaller than L"

    # Re-layout parameters once (tiny, outside the hot path).
    wdw = w_dw[:, 0, :].astype(jnp.float32)               # (Cin, k)
    wpw = w_pw[:, :, 0].astype(jnp.float32)               # (Cout, Cin)
    # Fold the depthwise bias into the pointwise bias:
    #   Wpw @ (dw + bdw) + bpw == Wpw @ dw + (Wpw @ bdw + bpw)
    bpw_eff = (wpw @ b_dw.astype(jnp.float32)
               + b_pw.astype(jnp.float32)).reshape(cout, 1)

    b_tile = _pick_b_tile(n, cin, cout, seq_len, x_ncl.dtype.itemsize)
    grid = (n // b_tile,)

    kernel = functools.partial(
        _dsconv1d_kernel, k=k, b_tile=b_tile, cin=cin, cout=cout,
        seq_len=seq_len, use_bf16_matmul=use_bf16_matmul)

    return pl.pallas_call(
        kernel,
        out_shape=jax.ShapeDtypeStruct((n, cout, seq_len), x_ncl.dtype),
        grid_spec=pltpu.PrefetchScalarGridSpec(
            num_scalar_prefetch=0,
            grid=grid,
            in_specs=[
                pl.BlockSpec((b_tile, cin, seq_len), lambda i: (i, 0, 0)),
                pl.BlockSpec((cin, k), lambda i: (0, 0)),
                pl.BlockSpec((cout, cin), lambda i: (0, 0)),
                pl.BlockSpec((cout, 1), lambda i: (0, 0)),
            ],
            out_specs=pl.BlockSpec((b_tile, cout, seq_len), lambda i: (i, 0, 0)),
        ),
        compiler_params=pltpu.CompilerParams(
            dimension_semantics=("parallel",)),
    )(x_ncl, wdw, wpw, bpw_eff)


def _reference(x_ncl, w_dw, b_dw, w_pw, b_pw, *, k):
    """Pure-JAX reference (matches PyTorch Conv1d cross-correlation)."""
    n, cin, seq_len = x_ncl.shape
    pad = k // 2
    xp = jnp.pad(x_ncl.astype(jnp.float32), ((0, 0), (0, 0), (pad, pad)))
    dw = jnp.zeros((n, cin, seq_len), jnp.float32)
    for t in range(k):
        dw = dw + xp[:, :, t:t + seq_len] * w_dw[:, 0, t][None, :, None]
    dw = dw + b_dw[None, :, None]
    pw = jnp.einsum('ncl,oc->nol', dw, w_pw[:, :, 0]) + b_pw[None, :, None]
    return pw


if __name__ == "__main__":
    # Module config (small, QANet-style 1D conv block).
    N, C_IN, C_OUT, L, K = 2, 4, 8, 16, 3

    key = jax.random.PRNGKey(0)
    k_x, k_dw, k_pw, k_bd, k_bp = jax.random.split(key, 5)

    # Deterministic params (PyTorch Conv1d weight shapes).  Biases are made
    # nonzero so the bias-folding path is actually exercised.
    w_dw = jax.random.normal(k_dw, (C_IN, 1, K), jnp.float32) * jnp.sqrt(2.0 / K)
    b_dw = jax.random.normal(k_bd, (C_IN,), jnp.float32) * 0.1
    w_pw = jax.random.normal(k_pw, (C_OUT, C_IN, 1), jnp.float32) * jnp.sqrt(1.0 / C_IN)
    b_pw = jax.random.normal(k_bp, (C_OUT,), jnp.float32) * 0.1

    x = jax.random.normal(k_x, (N, C_IN, L), jnp.float32)   # NCL, like PyTorch

    out = depthwise_separable_conv1d(x, w_dw, b_dw, w_pw, b_pw, k=K)
    out = jax.block_until_ready(out)

    ref = _reference(x, w_dw, b_dw, w_pw, b_pw, k=K)
    assert out.shape == (N, C_OUT, L), out.shape
    assert jnp.allclose(out, ref, atol=1e-5, rtol=1e-5), "mismatch vs reference"

    print("KERNEL_OK")
</pallas_src>

<mosaic_0001>
module attributes {stable_mosaic.version = 11 : i64} {
  func.func @_dsconv1d_kernel(%arg0: i32, %arg1: memref<2x4x16xf32, #tpu.memory_space<vmem>>, %arg2: memref<4x3xf32, #tpu.memory_space<vmem>>, %arg3: memref<8x4xf32, #tpu.memory_space<vmem>>, %arg4: memref<8x1xf32, #tpu.memory_space<vmem>>, %arg5: memref<2x8x16xf32, #tpu.memory_space<vmem>>) attributes {dimension_semantics = [#tpu.dimension_semantics<parallel>], iteration_bounds = array<i64: 1>, scalar_prefetch = 0 : i64, scratch_operands = 0 : i64, tpu.core_type = #tpu.core_type<tc>, window_params = [{transform_indices = @transform_0, window_bounds = array<i64: 2, 4, 16>}, {pipeline_mode = #tpu.pipeline_mode<synchronous>, transform_indices = @transform_1, window_bounds = array<i64: 4, 3>}, {pipeline_mode = #tpu.pipeline_mode<synchronous>, transform_indices = @transform_2, window_bounds = array<i64: 8, 4>}, {pipeline_mode = #tpu.pipeline_mode<synchronous>, transform_indices = @transform_3, window_bounds = array<i64: 8, 1>}, {transform_indices = @transform_4, window_bounds = array<i64: 2, 8, 16>}]} {
    %c0 = arith.constant 0 : index
    %c0_0 = arith.constant 0 : index
    %0 = vector.load %arg2[%c0, %c0_0] : memref<4x3xf32, #tpu.memory_space<vmem>>, vector<4x3xf32>
    %c0_1 = arith.constant 0 : index
    %c0_2 = arith.constant 0 : index
    %1 = vector.load %arg3[%c0_1, %c0_2] : memref<8x4xf32, #tpu.memory_space<vmem>>, vector<8x4xf32>
    %c0_3 = arith.constant 0 : index
    %c0_4 = arith.constant 0 : index
    %2 = vector.load %arg4[%c0_3, %c0_4] : memref<8x1xf32, #tpu.memory_space<vmem>>, vector<8x1xf32>
    %c0_5 = arith.constant 0 : index
    %c0_6 = arith.constant 0 : index
    %c0_7 = arith.constant 0 : index
    %3 = vector.load %arg1[%c0_5, %c0_6, %c0_7] : memref<2x4x16xf32, #tpu.memory_space<vmem>>, vector<2x4x16xf32>
    %cst = arith.constant 0.000000e+00 : f32
    %4 = vector.broadcast %cst : f32 to vector<2x4x1xf32>
    %5 = tpu.concatenate %4, %3, %4 in 2 : vector<2x4x1xf32>, vector<2x4x16xf32>, vector<2x4x1xf32> -> vector<2x4x18xf32>
    %6 = vector.extract_strided_slice %5 {offsets = [0, 0, 0], sizes = [2, 4, 16], strides = [1, 1, 1]} : vector<2x4x18xf32> to vector<2x4x16xf32>
    %7 = vector.extract_strided_slice %0 {offsets = [0, 0], sizes = [4, 1], strides = [1, 1]} : vector<4x3xf32> to vector<4x1xf32>
    %8 = vector.shape_cast %7 : vector<4x1xf32> to vector<1x4x1xf32>
    %9 = vector.broadcast %8 : vector<1x4x1xf32> to vector<2x4x16xf32>
    %10 = arith.mulf %6, %9 : vector<2x4x16xf32>
    %11 = vector.extract_strided_slice %5 {offsets = [0, 0, 1], sizes = [2, 4, 16], strides = [1, 1, 1]} : vector<2x4x18xf32> to vector<2x4x16xf32>
    %12 = vector.extract_strided_slice %0 {offsets = [0, 1], sizes = [4, 1], strides = [1, 1]} : vector<4x3xf32> to vector<4x1xf32>
    %13 = vector.shape_cast %12 : vector<4x1xf32> to vector<1x4x1xf32>
    %14 = vector.broadcast %13 : vector<1x4x1xf32> to vector<2x4x16xf32>
    %15 = arith.mulf %11, %14 : vector<2x4x16xf32>
    %16 = arith.addf %10, %15 : vector<2x4x16xf32>
    %17 = vector.extract_strided_slice %5 {offsets = [0, 0, 2], sizes = [2, 4, 16], strides = [1, 1, 1]} : vector<2x4x18xf32> to vector<2x4x16xf32>
    %18 = vector.extract_strided_slice %0 {offsets = [0, 2], sizes = [4, 1], strides = [1, 1]} : vector<4x3xf32> to vector<4x1xf32>
    %19 = vector.shape_cast %18 : vector<4x1xf32> to vector<1x4x1xf32>
    %20 = vector.broadcast %19 : vector<1x4x1xf32> to vector<2x4x16xf32>
    %21 = arith.mulf %17, %20 : vector<2x4x16xf32>
    %22 = arith.addf %16, %21 : vector<2x4x16xf32>
    %23 = vector.extract_strided_slice %1 {offsets = [0, 0], sizes = [8, 1], strides = [1, 1]} : vector<8x4xf32> to vector<8x1xf32>
    %24 = vector.shape_cast %23 : vector<8x1xf32> to vector<1x8x1xf32>
    %25 = vector.extract_strided_slice %22 {offsets = [0, 0, 0], sizes = [2, 1, 16], strides = [1, 1, 1]} : vector<2x4x16xf32> to vector<2x1x16xf32>
    %26 = vector.broadcast %24 : vector<1x8x1xf32> to vector<2x8x16xf32>
    %27 = vector.broadcast %25 : vector<2x1x16xf32> to vector<2x8x16xf32>
    %28 = arith.mulf %26, %27 : vector<2x8x16xf32>
    %29 = vector.extract_strided_slice %1 {offsets = [0, 1], sizes = [8, 1], strides = [1, 1]} : vector<8x4xf32> to vector<8x1xf32>
    %30 = vector.shape_cast %29 : vector<8x1xf32> to vector<1x8x1xf32>
    %31 = vector.extract_strided_slice %22 {offsets = [0, 1, 0], sizes = [2, 1, 16], strides = [1, 1, 1]} : vector<2x4x16xf32> to vector<2x1x16xf32>
    %32 = vector.broadcast %30 : vector<1x8x1xf32> to vector<2x8x16xf32>
    %33 = vector.broadcast %31 : vector<2x1x16xf32> to vector<2x8x16xf32>
    %34 = arith.mulf %32, %33 : vector<2x8x16xf32>
    %35 = arith.addf %28, %34 : vector<2x8x16xf32>
    %36 = vector.extract_strided_slice %1 {offsets = [0, 2], sizes = [8, 1], strides = [1, 1]} : vector<8x4xf32> to vector<8x1xf32>
    %37 = vector.shape_cast %36 : vector<8x1xf32> to vector<1x8x1xf32>
    %38 = vector.extract_strided_slice %22 {offsets = [0, 2, 0], sizes = [2, 1, 16], strides = [1, 1, 1]} : vector<2x4x16xf32> to vector<2x1x16xf32>
    %39 = vector.broadcast %37 : vector<1x8x1xf32> to vector<2x8x16xf32>
    %40 = vector.broadcast %38 : vector<2x1x16xf32> to vector<2x8x16xf32>
    %41 = arith.mulf %39, %40 : vector<2x8x16xf32>
    %42 = arith.addf %35, %41 : vector<2x8x16xf32>
    %43 = vector.extract_strided_slice %1 {offsets = [0, 3], sizes = [8, 1], strides = [1, 1]} : vector<8x4xf32> to vector<8x1xf32>
    %44 = vector.shape_cast %43 : vector<8x1xf32> to vector<1x8x1xf32>
    %45 = vector.extract_strided_slice %22 {offsets = [0, 3, 0], sizes = [2, 1, 16], strides = [1, 1, 1]} : vector<2x4x16xf32> to vector<2x1x16xf32>
    %46 = vector.broadcast %44 : vector<1x8x1xf32> to vector<2x8x16xf32>
    %47 = vector.broadcast %45 : vector<2x1x16xf32> to vector<2x8x16xf32>
    %48 = arith.mulf %46, %47 : vector<2x8x16xf32>
    %49 = arith.addf %42, %48 : vector<2x8x16xf32>
    %50 = vector.shape_cast %2 : vector<8x1xf32> to vector<1x8x1xf32>
    %51 = vector.broadcast %50 : vector<1x8x1xf32> to vector<2x8x16xf32>
    %52 = arith.addf %49, %51 : vector<2x8x16xf32>
    %c0_8 = arith.constant 0 : index
    %c0_9 = arith.constant 0 : index
    %c0_10 = arith.constant 0 : index
    %53 = vector.load %arg5[%c0_8, %c0_9, %c0_10] : memref<2x8x16xf32, #tpu.memory_space<vmem>>, vector<2x8x16xf32>
    tpu.vector_store %arg5[%c0_8, %c0_9, %c0_10], %52 {strides = array<i32>} : memref<2x8x16xf32, #tpu.memory_space<vmem>>, vector<2x8x16xf32>,
    return
  }
  func.func @transform_0(%arg0: i32) -> (i32, i32, i32) {
    %c0_i32 = arith.constant 0 : i32
    %c0_i32_0 = arith.constant 0 : i32
    %c0_i32_1 = arith.constant 0 : i32
    return %arg0, %c0_i32, %c0_i32_0 : i32, i32, i32
  }
  func.func @transform_1(%arg0: i32) -> (i32, i32) {
    %c0_i32 = arith.constant 0 : i32
    %c0_i32_0 = arith.constant 0 : i32
    %c0_i32_1 = arith.constant 0 : i32
    return %c0_i32, %c0_i32_0 : i32, i32
  }
  func.func @transform_2(%arg0: i32) -> (i32, i32) {
    %c0_i32 = arith.constant 0 : i32
    %c0_i32_0 = arith.constant 0 : i32
    %c0_i32_1 = arith.constant 0 : i32
    return %c0_i32, %c0_i32_0 : i32, i32
  }
  func.func @transform_3(%arg0: i32) -> (i32, i32) {
    %c0_i32 = arith.constant 0 : i32
    %c0_i32_0 = arith.constant 0 : i32
    %c0_i32_1 = arith.constant 0 : i32
    return %c0_i32, %c0_i32_0 : i32, i32
  }
  func.func @transform_4(%arg0: i32) -> (i32, i32, i32) {
    %c0_i32 = arith.constant 0 : i32
    %c0_i32_0 = arith.constant 0 : i32
    %c0_i32_1 = arith.constant 0 : i32
    return %arg0, %c0_i32, %c0_i32_0 : i32, i32, i32
  }
}

</mosaic_0001>

<bundles_post_ra>
// kernel: tpu_custom_call.1
= control target key start
LH: loop header
LB: loop body
LE: loop exit
PB: predicated region body
PF: predicated region fallthrough
CT: control target
= control target key end

     0   :  { %v206_v2 = vmov 1   ;;  %s207_s19 = smov 1   ;;  %v208_v4 = vmov 0   ;;  %s259_s0 = inlined_call_operand.vmem [shape: f32[2,4,16], index: 0, kind: input, shape index: {}]   ;;  %s260_s1 = inlined_call_operand.vmem [shape: f32[4,3], index: 1, kind: input, shape index: {}]   ;;  %s261_s2 = inlined_call_operand.vmem [shape: f32[8,4], index: 2, kind: input, shape index: {}]   ;;  %s262_s3 = inlined_call_operand.vmem [shape: f32[8,1], index: 3, kind: input, shape index: {}]   ;;  %s263_s4 = inlined_call_operand.hbm [shape: f32[2,8,16], index: 4, kind: output, shape index: {}]  }
   0x1   :  { %v21_v0 = vld [vmem:[%s259_s0] sm:$0xf]  ;;  %175 = vset.pattern.permute.xlu0 %v206_v2  ;;  %v22_v3 = vld [vmem:[%s259_s0 + $0x4] sm:$0xf]  ;;  %177 = vset.pattern.permute.xlu1 %v208_v4 }
   0x2   :  { %v18_v1 = vld [vmem:[%s260_s1] sm:$0xf]  ;;  %25 = vrot.lane.b32.xlu1 %v21_v0, %s207_s19 }
   0x3   :  { %45 = vperm.xlu0 %175, %v18_v1  }
   0x4   :  { %9 = vsyncpa [#allocation3], 0  ;;  %v209_v5 = vmov 2   ;;  %v19_v6 = vld [vmem:[%s261_s2] sm:$0xff]  ;;  %v210_v7 = vmov 3   ;;  %vm31_vm0 = vcmask 7168   ;;  %v81_v24 = vlaneseq }
   0x5   :  { %vm34_vm1 = vcmask 138240   ;;  %s211_s0 = smov 127   ;;  %s212_s1 = smov 126   ;;  %v20_v20 = vld [vmem:[%s262_s3] sm:$0xff]  ;;  %vm146_vm2 = vcmask 130048  }
   0x6   :  { %27 = vrot.lane.b32.xlu1 %v22_v3, %s207_s19  ;;  %v82_v29 = vshrl.u32 %v81_v24, 7  ;;  %s213_s3 = smov [#allocation2]  }
   0x7   :  { %176 = vset.pattern.permute.xlu0 %v209_v5  ;;  %s154_s25 = sshll.u32 %s213_s3, 4  ;;  %s155_s25 = int_to_ptr.vmem [resolvable:$true] %s154_s25 }
   0x8   :  { %61 = vperm.xlu0 %176, %v18_v1   ;;  %v83_v34 = vsub.s32 0, %v82_v29  ;;  %v97_v35 = vsub.s32 1, %v82_v29  ;;  %v113_v42 = vsub.s32 2, %v82_v29  ;;  %v129_v43 = vsub.s32 3, %v82_v29  ;;  %s184_s26 = scalar_lea.vmem %s155_s25, 256  ;;  %p189_p1 = scmp.lt.s32.totalorder %s155_s25, %s155_s25 }
   0x9   :  { %p185_p0 = scmp.ne.s32.totalorder %s155_s25, %s184_s26  ;;  %p190_p2 = scmp.lt.s32.totalorder %s184_s26, %s184_s26 }
   0xa   :  { %39 = vperm.xlu1 %177, %v18_v1  }
   0xb   :  { %p191_p3 = por %p190_p2, %p189_p1 }
   0xc   :  { %178 = vset.pattern.permute.xlu0 %v208_v4 }
   0xd   :  { %78 = vperm.xlu0 %178, %v19_v6   ;;  %p192_p4 = pnand %p191_p3, %p185_p0 }
   0xe   :  { %179 = vset.pattern.permute.xlu1 %v206_v2 }
   0xf   :  { %92 = vperm.xlu1 %179, %v19_v6  }
  0x11   :  { %181 = vset.pattern.permute.xlu0 %v210_v7 }
  0x13   :  { %180 = vset.pattern.permute.xlu1 %v209_v5 }
  0x74   :  { %v26_v8 = vpop.permute.xlu1 %25 }
  0x75   :  { %v32_v11 = vsel %vm31_vm0, 0.0, %v26_v8 }
  0x76   :  { %v35_v13 = vsel %vm34_vm1, %v32_v11, 0.0 }
  0x78   :  { %v28_v9 = vpop.permute.xlu1 %27 }
  0x79   :  { %v33_v10 = vsel %vm31_vm0, 0.0, %v28_v9 }
  0x7a   :  { %v36_v12 = vsel %vm34_vm1, %v33_v10, 0.0 }
  0x7e   :  { %v46_v14 = vpop.permute.xlu0 %45 }
  0x7f   :  { %v48_v15 = vmul.f32 %v46_v14, %v35_v13  ;;  %v49_v16 = vmul.f32 %v46_v14, %v36_v12 }
  0x81   :  { %54 = vrot.lane.b32.xlu1 %v49_v16, %s211_s0  ;;  %52 = vrot.lane.b32.xlu0 %v48_v15, %s211_s0 }
  0x83   :  { %v62_v17 = vpop.permute.xlu0 %61 }
  0x84   :  { %v64_v18 = vmul.f32 %v62_v17, %v35_v13  ;;  %v65_v19 = vmul.f32 %v62_v17, %v36_v12 }
  0x85   :  { %v40_v21 = vpop.permute.xlu1 %39 }
  0x86   :  { %70 = vrot.lane.b32.xlu0 %v65_v19, %s212_s1  ;;  %68 = vrot.lane.b32.xlu1 %v64_v18, %s212_s1  ;;  %v42_v27 = vmul.f32 %v40_v21, %v35_v13  ;;  %v43_v28 = vmul.f32 %v40_v21, %v36_v12 }
  0x88   :  { %v79_v23 = vpop.permute.xlu0 %78 }
  0x8a   :  { %124 = vperm.xlu0 %181, %v19_v6   ;;  %108 = vperm.xlu1 %180, %v19_v6   ;;  %v93_v22 = vpop.permute.xlu1 %92 }
  0x8e   :  { %182 = vset.pattern.permute.xlu1 %v208_v4  ;;  %183 = vset.pattern.permute.xlu0 %v208_v4 }
  0x8f   :  { %141 = vperm.xlu1 %182, %v20_v20  }
  0xf3   :  { %v55_v25 = vpop.permute.xlu1 %54  ;;  %v53_v26 = vpop.permute.xlu0 %52 }
  0xf4   :  { %v59_v30 = vadd.f32 %v55_v25, %v43_v28  ;;  %v58_v31 = vadd.f32 %v53_v26, %v42_v27 }
  0xf8   :  { %v69_v32 = vpop.permute.xlu1 %68  ;;  %v71_v33 = vpop.permute.xlu0 %70 }
  0xf9   :  { %v74_v36 = vadd.f32 %v69_v32, %v58_v31  ;;  %v75_v37 = vadd.f32 %v71_v33, %v59_v30 }
  0xfb   :  { %v84_v38 = vrot.slane %v74_v36, %v83_v34  ;;  %v98_v39 = vrot.slane %v74_v36, %v97_v35  ;;  %v88_v40 = vrot.slane %v75_v37, %v83_v34  ;;  %v102_v41 = vrot.slane %v75_v37, %v97_v35 }
  0xfc   :  { %v114_v48 = vrot.slane %v74_v36, %v113_v42  ;;  %v118_v49 = vrot.slane %v75_v37, %v113_v42  ;;  %v130_v51 = vrot.slane %v74_v36, %v129_v43  ;;  %v134_v52 = vrot.slane %v75_v37, %v129_v43 }
  0xfd   :  { %v89_v44 = vmul.f32 %v84_v38, %v79_v23  ;;  %v90_v45 = vmul.f32 %v88_v40, %v79_v23  ;;  %v103_v46 = vmul.f32 %v98_v39, %v93_v22  ;;  %v104_v47 = vmul.f32 %v102_v41, %v93_v22 }
  0xff   :  { %v105_v54 = vadd.f32 %v103_v46, %v89_v44  ;;  %v106_v55 = vadd.f32 %v104_v47, %v90_v45 }
 0x105   :  { %v109_v50 = vpop.permute.xlu1 %108  ;;  %v125_v53 = vpop.permute.xlu0 %124 }
 0x106   :  { %v119_v56 = vmul.f32 %v114_v48, %v109_v50  ;;  %v120_v57 = vmul.f32 %v118_v49, %v109_v50  ;;  %v135_v60 = vmul.f32 %v130_v51, %v125_v53  ;;  %v136_v61 = vmul.f32 %v134_v52, %v125_v53 }
 0x108   :  { %v121_v58 = vadd.f32 %v119_v56, %v105_v54  ;;  %v122_v59 = vadd.f32 %v120_v57, %v106_v55 }
 0x10a   :  { %v142_v62 = vpop.permute.xlu1 %141  ;;  %v137_v63 = vadd.f32 %v135_v60, %v121_v58  ;;  %v138_v0 = vadd.f32 %v136_v61, %v122_v59 }
 0x10c   :  { %v144_v1 = vadd.f32 %v142_v62, %v137_v63  ;;  %v145_v2 = vadd.f32 %v142_v62, %v138_v0 }
 0x10e   :  { %147 = vst.msk [vmem:[#allocation2] sm:$0xff] %vm146_vm2, %v144_v1  ;;  %148 = vst.msk [vmem:[#allocation2 + $0x8] sm:$0xff] %vm146_vm2, %v145_v2 }
 0x10f   :  { %195 = shalt.err (!%p192_p4)
}
 0x110   :  { %s214_s27 = smov 128   ;;  %s215_s28 = smov 8  }
 0x111   :  { %160 = dma.vmem_to_hbm [thread:$0]  %s155_s25, 256, %s263_s4, [#allocation3], %s214_s27, %s214_s27, %s215_s28  }
 0x112   :  { %204 = dma.done.wait [#allocation3], 256  }
 0x113   :  { %205 = vsyncadd [#allocation3], 4294967040 }
 0x114   :  { %164 = vsyncpa [#allocation3], 1 }

</bundles_post_ra>
